<compile_context>
chip_gen: v5e
topology: v5e:2x2
jax: 0.10.0
libtpu: 0.0.40
codegen_flags: <defaults>
</compile_context>

<pallas_src>
import numpy as np
import jax
import jax.numpy as jnp
from jax.experimental import pallas as pl
from jax.experimental.pallas import tpu as pltpu


def _binomial_filter(filt_size: int) -> np.ndarray:
    taps = {
        1: [1.0],
        2: [1.0, 1.0],
        3: [1.0, 2.0, 1.0],
        4: [1.0, 3.0, 3.0, 1.0],
        5: [1.0, 4.0, 6.0, 4.0, 1.0],
        6: [1.0, 5.0, 10.0, 10.0, 5.0, 1.0],
        7: [1.0, 6.0, 15.0, 20.0, 15.0, 6.0, 1.0],
    }[filt_size]
    a = np.asarray(taps, dtype=np.float64)
    return (a / a.sum()).astype(np.float32)


def _round_up(v: int, m: int) -> int:
    return ((v + m - 1) // m) * m


def _make_tapsum_kernel(taps):
    """Kernel: out = sum_k taps[k] * tap_slab_k, accumulated in f32 on the VPU."""
    taps = [float(t) for t in taps]

    def kernel(*refs):
        o_ref = refs[-1]
        acc = refs[0][...].astype(jnp.float32) * taps[0]
        for k in range(1, len(taps)):
            acc = acc + refs[k][...].astype(jnp.float32) * taps[k]
        o_ref[...] = acc.astype(o_ref.dtype)

    return kernel


def downsample1d(x, *, pad_type="reflect", filt_size=3, stride=2, pad_off=0):
    """JAX/Pallas equivalent of Downsample1D.forward.  x: (N, C, L)."""
    n, c, l = x.shape
    pad_l = (filt_size - 1) // 2 + pad_off
    pad_r = int(np.ceil((filt_size - 1) / 2.0)) + pad_off

    mode = {
        "reflect": "reflect", "refl": "reflect",
        "replicate": "edge", "repl": "edge",
        "zero": "constant",
    }[pad_type]

    if filt_size == 1:
        if pad_off == 0:
            return x[:, :, ::stride]
        x_pad = jnp.pad(x, ((0, 0), (0, 0), (pad_l, pad_r)), mode=mode)
        return x_pad[:, :, ::stride]

    nc = n * c
    x2 = x.reshape(nc, l)
    x_pad = jnp.pad(x2, ((0, 0), (pad_l, pad_r)), mode=mode)
    l_pad = l + pad_l + pad_r
    l_out = (l_pad - filt_size) // stride + 1

    filt = _binomial_filter(filt_size)  # deterministic "parameter" init

    # ---- tiling / padding for lane-dense, pipelined blocks -----------------
    lo_pad = _round_up(l_out, 128)                       # lane-dense output
    tm = 256 if nc >= 256 else _round_up(nc, 8)          # row tile (mult of 8)
    ncp = _round_up(nc, tm)
    tn = next(t for t in (512, 256, 128) if lo_pad % t == 0)  # lane tile

    # ---- per-tap slabs (XLA-fused pad + strided de-interleave) -------------
    slabs = []
    for k in range(filt_size):
        s = x_pad[:, k: k + stride * (l_out - 1) + 1: stride]     # (nc, l_out)
        s = jnp.pad(s, ((0, ncp - nc), (0, lo_pad - l_out)))      # (ncp, lo_pad)
        slabs.append(s)

    grid = (ncp // tm, lo_pad // tn)
    spec = pl.BlockSpec((tm, tn), lambda i, j: (i, j))
    itemsize = jnp.dtype(x.dtype).itemsize

    out = pl.pallas_call(
        _make_tapsum_kernel(filt),
        out_shape=jax.ShapeDtypeStruct((ncp, lo_pad), x.dtype),
        grid=grid,
        in_specs=[spec] * filt_size,
        out_specs=spec,
        compiler_params=pltpu.CompilerParams(
            dimension_semantics=("parallel", "parallel")),
        cost_estimate=pl.CostEstimate(
            flops=2 * filt_size * ncp * lo_pad,
            transcendentals=0,
            bytes_accessed=(filt_size + 1) * ncp * lo_pad * itemsize),
    )(*slabs)

    return out[:nc, :l_out].reshape(n, c, l_out)


if __name__ == "__main__":
    key = jax.random.PRNGKey(0)
    N, C, L = 2, 4, 16
    x = jax.random.normal(key, (N, C, L), dtype=jnp.float32)

    fn = jax.jit(lambda v: downsample1d(v, pad_type="reflect",
                                        filt_size=3, stride=2, pad_off=0))
    y = jax.block_until_ready(fn(x))

    # pure-JAX reference of the same math (reflect pad + stride-2 binomial filter)
    L_out = (L + 2 - 3) // 2 + 1
    x_pad = jnp.pad(x, ((0, 0), (0, 0), (1, 1)), mode="reflect")
    filt = jnp.asarray(_binomial_filter(3))
    ref = sum(filt[k] * x_pad[:, :, k: k + 2 * (L_out - 1) + 1: 2] for k in range(3))

    assert y.shape == (N, C, L_out), y.shape
    assert jnp.allclose(y, ref, atol=1e-5), float(jnp.max(jnp.abs(y - ref)))

    print("KERNEL_OK")
</pallas_src>

<mosaic_0001>
module attributes {stable_mosaic.version = 11 : i64} {
  func.func @kernel(%arg0: i32, %arg1: i32, %arg2: memref<8x128xf32, #tpu.memory_space<vmem>>, %arg3: memref<8x128xf32, #tpu.memory_space<vmem>>, %arg4: memref<8x128xf32, #tpu.memory_space<vmem>>, %arg5: memref<8x128xf32, #tpu.memory_space<vmem>>) attributes {dimension_semantics = [#tpu.dimension_semantics<parallel>, #tpu.dimension_semantics<parallel>], iteration_bounds = array<i64: 1, 1>, scalar_prefetch = 0 : i64, scratch_operands = 0 : i64, tpu.core_type = #tpu.core_type<tc>, window_params = [{transform_indices = @transform_0, window_bounds = array<i64: 8, 128>}, {transform_indices = @transform_1, window_bounds = array<i64: 8, 128>}, {transform_indices = @transform_2, window_bounds = array<i64: 8, 128>}, {transform_indices = @transform_3, window_bounds = array<i64: 8, 128>}]} {
    %c0 = arith.constant 0 : index
    %c0_0 = arith.constant 0 : index
    %0 = vector.load %arg2[%c0, %c0_0] : memref<8x128xf32, #tpu.memory_space<vmem>>, vector<8x128xf32>
    %cst = arith.constant 2.500000e-01 : f32
    %1 = vector.broadcast %cst : f32 to vector<8x128xf32>
    %2 = arith.mulf %0, %1 : vector<8x128xf32>
    %c0_1 = arith.constant 0 : index
    %c0_2 = arith.constant 0 : index
    %3 = vector.load %arg3[%c0_1, %c0_2] : memref<8x128xf32, #tpu.memory_space<vmem>>, vector<8x128xf32>
    %cst_3 = arith.constant 5.000000e-01 : f32
    %4 = vector.broadcast %cst_3 : f32 to vector<8x128xf32>
    %5 = arith.mulf %3, %4 : vector<8x128xf32>
    %6 = arith.addf %2, %5 : vector<8x128xf32>
    %c0_4 = arith.constant 0 : index
    %c0_5 = arith.constant 0 : index
    %7 = vector.load %arg4[%c0_4, %c0_5] : memref<8x128xf32, #tpu.memory_space<vmem>>, vector<8x128xf32>
    %cst_6 = arith.constant 2.500000e-01 : f32
    %8 = vector.broadcast %cst_6 : f32 to vector<8x128xf32>
    %9 = arith.mulf %7, %8 : vector<8x128xf32>
    %10 = arith.addf %6, %9 : vector<8x128xf32>
    %c0_7 = arith.constant 0 : index
    %c0_8 = arith.constant 0 : index
    %11 = vector.load %arg5[%c0_7, %c0_8] : memref<8x128xf32, #tpu.memory_space<vmem>>, vector<8x128xf32>
    tpu.vector_store %arg5[%c0_7, %c0_8], %10 {strides = array<i32>} : memref<8x128xf32, #tpu.memory_space<vmem>>, vector<8x128xf32>,
    return
  }
  func.func @transform_0(%arg0: i32, %arg1: i32) -> (i32, i32) {
    %c0_i32 = arith.constant 0 : i32
    return %arg0, %arg1 : i32, i32
  }
  func.func @transform_1(%arg0: i32, %arg1: i32) -> (i32, i32) {
    %c0_i32 = arith.constant 0 : i32
    return %arg0, %arg1 : i32, i32
  }
  func.func @transform_2(%arg0: i32, %arg1: i32) -> (i32, i32) {
    %c0_i32 = arith.constant 0 : i32
    return %arg0, %arg1 : i32, i32
  }
  func.func @transform_3(%arg0: i32, %arg1: i32) -> (i32, i32) {
    %c0_i32 = arith.constant 0 : i32
    return %arg0, %arg1 : i32, i32
  }
}

</mosaic_0001>

<bundles_post_ra>
// kernel: _lambda_.1
= control target key start
LH: loop header
LB: loop body
LE: loop exit
PB: predicated region body
PF: predicated region fallthrough
CT: control target
= control target key end

     0   :  { %s100_s0 = inlined_call_operand.vmem [shape: f32[8,128], index: 0, kind: input, shape index: {}]   ;;  %s101_s1 = inlined_call_operand.vmem [shape: f32[8,128], index: 1, kind: input, shape index: {}]   ;;  %s102_s2 = inlined_call_operand.vmem [shape: f32[8,128], index: 2, kind: input, shape index: {}]   ;;  %s103_s3 = inlined_call_operand.hbm [shape: f32[8,128], index: 3, kind: output, shape index: {}]  }
   0x1   :  { %v15_v0 = vld [vmem:[%s100_s0] sm:$0xff] }
   0x2   :  { %v17_v1 = vld [vmem:[%s101_s1] sm:$0xff]  ;;  %v16_v3 = vmul.f32 0.25, %v15_v0 }
   0x3   :  { %v20_v2 = vld [vmem:[%s102_s2] sm:$0xff]  ;;  %v18_v4 = vmul.f32 0.5, %v17_v1 }
   0x4   :  { %v21_v5 = vmul.f32 0.25, %v20_v2 }
   0x5   :  { %8 = vsyncpa [#allocation3], 0  ;;  %s67_s18 = smov [#allocation2]   ;;  %s31_s22 = sshll.u32 %s103_s3, 4  ;;  %v19_v6 = vadd.f32 %v18_v4, %v16_v3  ;;  %s32_s22 = int_to_ptr.hbm [resolvable:$true] %s31_s22 }
   0x6   :  { %s29_s19 = sshll.u32 %s67_s18, 4  ;;  %s30_s19 = int_to_ptr.vmem [resolvable:$true] %s29_s19 }
   0x7   :  { %v22_v7 = vadd.f32 %v21_v5, %v19_v6 }
   0x9   :  { %23 = vst [vmem:[#allocation2] sm:$0xff] %v22_v7 }
   0xa   :  { %34 = dma.vmem_to_hbm [thread:$0]  %s30_s19, 128, %s32_s22, [#allocation3]  }
   0xb   :  { %65 = dma.done.wait [#allocation3], 128  }
   0xc   :  { %66 = vsyncadd [#allocation3], 4294967168 }
   0xd   :  { %39 = vsyncpa [#allocation3], 1 }

</bundles_post_ra>
